<compile_context>
chip_gen: v5e
topology: v5e:2x2
jax: 0.10.0
libtpu: 0.0.40
codegen_flags: <defaults>
</compile_context>

<pallas_src>
import functools

import jax
import jax.numpy as jnp
from jax import lax
from jax.experimental import pallas as pl
from jax.experimental.pallas import tpu as pltpu


def _multi_bandwidth_sum(l2, scale0, kernel_mul, kernel_num):
    """sum_i exp(l2 * scale0 * kernel_mul**i), i = 0..kernel_num-1.

    scale0 is the smallest-magnitude (largest-bandwidth) scale.  For
    kernel_mul == 2 the remaining bandwidths are obtained by repeated
    elementwise squaring (VALU slots) instead of extra exp passes (EUP slot).
    """
    e = jnp.exp(l2 * scale0)
    k_sum = e
    if kernel_mul == 2.0:
        for _ in range(kernel_num - 1):
            e = e * e
            k_sum = k_sum + e
    else:
        for i in range(1, kernel_num):
            k_sum = k_sum + jnp.exp(l2 * (scale0 * (kernel_mul ** i)))
    return k_sum


# ----------------------------------------------------------------------------
# Single-VMEM-block path (small N).
# ----------------------------------------------------------------------------
def _mmd_rbf_single_kernel(src_ref, tgt_ref, out_ref, total_ref, *,
                           batch_size, kernel_mul, kernel_num):
    b = batch_size
    n = 2 * b

    # Assemble total = [source; target] in VMEM (no HBM concatenate), f32.
    total_ref[0:b, :] = src_ref[...].astype(jnp.float32)
    total_ref[b:n, :] = tgt_ref[...].astype(jnp.float32)
    # Mean-center: pairwise distances are translation invariant; keeps the
    # sq + sq.T - 2*gram identity numerically well conditioned in f32.
    total = total_ref[...]
    total = total - jnp.mean(total, axis=0, keepdims=True)

    # Gram on the MXU, contracting the feature axis of both operands.
    gram = lax.dot_general(
        total, total,
        dimension_numbers=(((1,), (1,)), ((), ())),
        preferred_element_type=jnp.float32)                           # (N,N)
    sq = jnp.sum(total * total, axis=1, keepdims=True)                # (N,1)
    l2 = jnp.maximum(sq + sq.T - 2.0 * gram, 0.0)                     # (N,N)

    # Analytic bandwidth: sum_ij ||xi-xj||^2 = 2N*sum||xi||^2 - 2||sum_i xi||^2.
    col_sum = jnp.sum(total, axis=0, keepdims=True)                   # (1,D)
    l2_sum = 2.0 * float(n) * jnp.sum(sq) - 2.0 * jnp.sum(col_sum * col_sum)
    bandwidth = l2_sum / float(n * n - n)
    bandwidth = bandwidth / (kernel_mul ** (kernel_num // 2))
    # Smallest-magnitude scale (largest bandwidth).
    scale0 = -1.0 / (bandwidth * (kernel_mul ** (kernel_num - 1)))

    k_sum = _multi_bandwidth_sum(l2, scale0, kernel_mul, kernel_num)  # (N,N)

    # Quadrant signs as +-1 vectors (no (N,N) sign matrix): sign_jk = s_j*s_k.
    s_row = jnp.where(lax.broadcasted_iota(jnp.int32, (n, 1), 0) < b, 1.0, -1.0)
    s_col = jnp.where(lax.broadcasted_iota(jnp.int32, (1, n), 1) < b, 1.0, -1.0)
    row_part = jnp.sum(k_sum * s_col, axis=1, keepdims=True)          # (N,1)
    out_ref[0, 0] = jnp.sum(row_part * s_row) / float(b * b)


def _mmd_rbf_single(source, target, kernel_mul, kernel_num):
    b, d = source.shape
    n = 2 * b
    mul2 = float(kernel_mul) == 2.0
    kernel = functools.partial(
        _mmd_rbf_single_kernel,
        batch_size=int(b),
        kernel_mul=float(kernel_mul),
        kernel_num=int(kernel_num))
    cost = pl.CostEstimate(
        flops=2 * n * n * d + (3 + 2 * kernel_num) * n * n,
        transcendentals=(n * n) if mul2 else kernel_num * n * n,
        bytes_accessed=2 * b * d * jnp.dtype(source.dtype).itemsize + 4,
    )
    out = pl.pallas_call(
        kernel,
        out_shape=jax.ShapeDtypeStruct((1, 1), jnp.float32),
        in_specs=[
            pl.BlockSpec(memory_space=pltpu.MemorySpace.VMEM),
            pl.BlockSpec(memory_space=pltpu.MemorySpace.VMEM),
        ],
        out_specs=pl.BlockSpec(memory_space=pltpu.MemorySpace.SMEM),
        scratch_shapes=[pltpu.VMEM((n, d), jnp.float32)],
        cost_estimate=cost,
    )(source, target)
    return out[0, 0]


# ----------------------------------------------------------------------------
# Tiled 2-D-grid path (bounded VMEM, streamed).
# ----------------------------------------------------------------------------
def _mmd_rbf_tiled_kernel(scale_ref, rows_ref, colsT_ref, sq_r_ref, sq_c_ref,
                          s_r_ref, s_c_ref, out_ref, *, kernel_mul, kernel_num):
    # Plain row-major matmul: rows (Tn, D) @ pre-transposed cols (D, Tn).
    gram = jnp.dot(rows_ref[...], colsT_ref[...],
                   preferred_element_type=jnp.float32)                # (Tn,Tn)
    l2 = jnp.maximum(sq_r_ref[...] + sq_c_ref[...] - 2.0 * gram, 0.0)
    k_sum = _multi_bandwidth_sum(l2, scale_ref[0, 0], kernel_mul, kernel_num)

    # Fold column sign, reduce within the tile, apply row sign; accumulate
    # per-row-block partial sums across the j (column-block) grid axis.
    row_part = jnp.sum(k_sum * s_c_ref[...], axis=1, keepdims=True) * s_r_ref[...]

    @pl.when(pl.program_id(1) == 0)
    def _():
        out_ref[...] = jnp.zeros_like(out_ref)

    out_ref[...] += row_part


def _mmd_rbf_tiled(source, target, kernel_mul, kernel_num, tile_n):
    b, d = source.shape
    n = 2 * b
    nb = n // tile_n

    # O(N*D) prep in plain JAX: centered total, row norms, analytic bandwidth.
    total = jnp.concatenate([source, target], axis=0).astype(jnp.float32)
    total = total - jnp.mean(total, axis=0, keepdims=True)
    sq = jnp.sum(total * total, axis=1, keepdims=True)                # (N,1)
    col_sum = jnp.sum(total, axis=0, keepdims=True)
    l2_sum = 2.0 * float(n) * jnp.sum(sq) - 2.0 * jnp.sum(col_sum * col_sum)
    bandwidth = l2_sum / float(n * n - n)
    bandwidth = bandwidth / (kernel_mul ** (kernel_num // 2))
    scale0 = -1.0 / (bandwidth * (kernel_mul ** (kernel_num - 1)))
    scale0 = jnp.reshape(scale0, (1, 1)).astype(jnp.float32)

    sign = jnp.where(jnp.arange(n) < b, 1.0, -1.0).astype(jnp.float32)
    sign = jnp.reshape(sign, (n, 1))                                  # (N,1)
    total_t = total.T          # (D,N): one wrapper transpose, none per tile
    sq_t = sq.T                # (1,N)
    sign_t = sign.T            # (1,N)

    mul2 = float(kernel_mul) == 2.0
    cost = pl.CostEstimate(
        flops=2 * n * n * d + (3 + 2 * kernel_num) * n * n,
        transcendentals=(n * n) if mul2 else kernel_num * n * n,
        bytes_accessed=(nb + 1) * n * d * 4 + 6 * n * 4,
    )
    kernel = functools.partial(
        _mmd_rbf_tiled_kernel,
        kernel_mul=float(kernel_mul),
        kernel_num=int(kernel_num))

    row_sums = pl.pallas_call(
        kernel,
        out_shape=jax.ShapeDtypeStruct((n, 1), jnp.float32),
        grid=(nb, nb),
        in_specs=[
            pl.BlockSpec(memory_space=pltpu.MemorySpace.SMEM),        # scale0 (1,1)
            pl.BlockSpec((tile_n, d), lambda i, j: (i, 0)),           # row block of total
            pl.BlockSpec((d, tile_n), lambda i, j: (0, j)),           # col block (pre-T)
            pl.BlockSpec((tile_n, 1), lambda i, j: (i, 0)),           # row norms
            pl.BlockSpec((1, tile_n), lambda i, j: (0, j)),           # col norms (pre-T)
            pl.BlockSpec((tile_n, 1), lambda i, j: (i, 0)),           # row signs
            pl.BlockSpec((1, tile_n), lambda i, j: (0, j)),           # col signs (pre-T)
        ],
        out_specs=pl.BlockSpec((tile_n, 1), lambda i, j: (i, 0)),
        compiler_params=pltpu.CompilerParams(
            dimension_semantics=("parallel", "arbitrary"),
            vmem_limit_bytes=64 * 1024 * 1024),
        cost_estimate=cost,
    )(scale0, total, total_t, sq, sq_t, sign, sign_t)

    return jnp.sum(row_sums) / float(b * b)


# ----------------------------------------------------------------------------
# Public entry point (path selection).
# ----------------------------------------------------------------------------
def mmd_loss_rbf(source, target, kernel_mul=2.0, kernel_num=5):
    """Pallas implementation of MMD_loss(kernel_type='rbf').forward(source, target)."""
    assert source.shape == target.shape and source.ndim == 2
    b, _ = source.shape
    n = 2 * b

    tile_n = None
    if n >= 256:
        for t in (512, 256, 128):
            if n % t == 0 and n // t >= 2:
                tile_n = t
                break
    if tile_n is not None:
        return _mmd_rbf_tiled(source, target, kernel_mul, kernel_num, tile_n)
    return _mmd_rbf_single(source, target, kernel_mul, kernel_num)


def mmd_loss_rbf_ref(source, target, kernel_mul=2.0, kernel_num=5):
    """Pure-JAX reference mirroring the PyTorch code (broadcast-diff L2)."""
    total = jnp.concatenate([source, target], axis=0).astype(jnp.float32)
    n = total.shape[0]
    diff = total[None, :, :] - total[:, None, :]
    l2 = jnp.sum(diff ** 2, axis=2)
    bw = jnp.sum(l2) / (n * n - n)
    bw = bw / (kernel_mul ** (kernel_num // 2))
    k = sum(jnp.exp(-l2 / (bw * (kernel_mul ** i))) for i in range(kernel_num))
    b = source.shape[0]
    return (jnp.mean(k[:b, :b]) + jnp.mean(k[b:, b:])
            - jnp.mean(k[:b, b:]) - jnp.mean(k[b:, :b]))


if __name__ == "__main__":
    key = jax.random.PRNGKey(0)
    k1, k2, k3, k4 = jax.random.split(key, 4)

    # Small case -> single-VMEM-block path.
    b1, d1 = 8, 32
    src1 = jax.random.normal(k1, (b1, d1), dtype=jnp.float32)
    tgt1 = jax.random.normal(k2, (b1, d1), dtype=jnp.float32) + 0.5
    loss1 = jax.block_until_ready(mmd_loss_rbf(src1, tgt1))
    ref1 = jax.block_until_ready(mmd_loss_rbf_ref(src1, tgt1))
    assert abs(float(loss1) - float(ref1)) < 2e-3, (float(loss1), float(ref1))

    # Larger case -> tiled 2-D-grid path (N = 256, Tn = 128, grid (2, 2)).
    b2, d2 = 128, 128
    src2 = jax.random.normal(k3, (b2, d2), dtype=jnp.float32)
    tgt2 = jax.random.normal(k4, (b2, d2), dtype=jnp.float32) + 0.25
    loss2 = jax.block_until_ready(mmd_loss_rbf(src2, tgt2))
    ref2 = jax.block_until_ready(mmd_loss_rbf_ref(src2, tgt2))
    tol2 = 2e-3 * max(1.0, abs(float(ref2)))
    assert abs(float(loss2) - float(ref2)) < tol2, (float(loss2), float(ref2))

    print("KERNEL_OK")
</pallas_src>

<mosaic_0001>
module attributes {stable_mosaic.version = 11 : i64} {
  func.func @_mmd_rbf_single_kernel(%arg0: memref<8x32xf32, #tpu.memory_space<vmem>>, %arg1: memref<8x32xf32, #tpu.memory_space<vmem>>, %arg2: memref<1x1xf32, #tpu.memory_space<smem>>, %arg3: memref<16x32xf32, #tpu.memory_space<vmem>>) attributes {dimension_semantics = [], scalar_prefetch = 0 : i64, scratch_operands = 1 : i64, tpu.core_type = #tpu.core_type<tc>} {
    %c0 = arith.constant 0 : index
    %c0_0 = arith.constant 0 : index
    %0 = vector.load %arg0[%c0, %c0_0] : memref<8x32xf32, #tpu.memory_space<vmem>>, vector<8x32xf32>
    %c0_1 = arith.constant 0 : index
    %c0_2 = arith.constant 0 : index
    %1 = vector.load %arg3[%c0_1, %c0_2] : memref<16x32xf32, #tpu.memory_space<vmem>>, vector<8x32xf32>
    tpu.vector_store %arg3[%c0_1, %c0_2], %0 {strides = array<i32>} : memref<16x32xf32, #tpu.memory_space<vmem>>, vector<8x32xf32>,
    %c0_3 = arith.constant 0 : index
    %c0_4 = arith.constant 0 : index
    %2 = vector.load %arg1[%c0_3, %c0_4] : memref<8x32xf32, #tpu.memory_space<vmem>>, vector<8x32xf32>
    %c8 = arith.constant 8 : index
    %c0_5 = arith.constant 0 : index
    %3 = vector.load %arg3[%c8, %c0_5] : memref<16x32xf32, #tpu.memory_space<vmem>>, vector<8x32xf32>
    tpu.vector_store %arg3[%c8, %c0_5], %2 {strides = array<i32>} : memref<16x32xf32, #tpu.memory_space<vmem>>, vector<8x32xf32>,
    %c0_6 = arith.constant 0 : index
    %c0_7 = arith.constant 0 : index
    %4 = vector.load %arg3[%c0_6, %c0_7] : memref<16x32xf32, #tpu.memory_space<vmem>>, vector<16x32xf32>
    %cst = arith.constant dense<0.000000e+00> : vector<32xf32>
    %5 = vector.multi_reduction <add>, %4, %cst [0] : vector<16x32xf32> to vector<32xf32>
    %6 = vector.shape_cast %5 : vector<32xf32> to vector<1x32xf32>
    %cst_8 = arith.constant 1.600000e+01 : f32
    %7 = vector.broadcast %cst_8 : f32 to vector<1x32xf32>
    %8 = arith.divf %6, %7 : vector<1x32xf32>
    %9 = vector.broadcast %8 : vector<1x32xf32> to vector<16x32xf32>
    %10 = arith.subf %4, %9 : vector<16x32xf32>
    %cst_9 = arith.constant dense<0.000000e+00> : vector<16x16xf32>
    %11 = tpu.matmul %10, %10, %cst_9 {dimension_numbers = #tpu.dot_dimension_numbers<[1], [1], [0], [0], [0, 0, 1, 0], [], []>} : vector<16x32xf32>, vector<16x32xf32>, vector<16x16xf32> -> vector<16x16xf32>
    %12 = arith.mulf %10, %10 : vector<16x32xf32>
    %cst_10 = arith.constant dense<0.000000e+00> : vector<16xf32>
    %13 = vector.multi_reduction <add>, %12, %cst_10 [1] : vector<16x32xf32> to vector<16xf32>
    %14 = vector.shape_cast %13 : vector<16xf32> to vector<16x1xf32>
    %15 = tpu.transpose %14, [1, 0] : vector<16x1xf32> -> vector<1x16xf32>
    %16 = vector.broadcast %14 : vector<16x1xf32> to vector<16x16xf32>
    %17 = vector.broadcast %15 : vector<1x16xf32> to vector<16x16xf32>
    %18 = arith.addf %16, %17 : vector<16x16xf32>
    %cst_11 = arith.constant 2.000000e+00 : f32
    %19 = vector.broadcast %cst_11 : f32 to vector<16x16xf32>
    %20 = arith.mulf %19, %11 : vector<16x16xf32>
    %21 = arith.subf %18, %20 : vector<16x16xf32>
    %cst_12 = arith.constant 0.000000e+00 : f32
    %22 = vector.broadcast %cst_12 : f32 to vector<16x16xf32>
    %23 = arith.maximumf %21, %22 : vector<16x16xf32>
    %cst_13 = arith.constant dense<0.000000e+00> : vector<32xf32>
    %24 = vector.multi_reduction <add>, %10, %cst_13 [0] : vector<16x32xf32> to vector<32xf32>
    %25 = vector.shape_cast %24 : vector<32xf32> to vector<1x32xf32>
    %26 = vector.shape_cast %14 : vector<16x1xf32> to vector<1x16x1xf32>
    %cst_14 = arith.constant dense<0.000000e+00> : vector<1xf32>
    %27 = vector.multi_reduction <add>, %26, %cst_14 [1, 2] : vector<1x16x1xf32> to vector<1xf32>
    %28 = vector.shape_cast %27 : vector<1xf32> to vector<1x1x1xf32>
    %29 = vector.extract %28[0, 0, 0] : f32 from vector<1x1x1xf32>
    %cst_15 = arith.constant 3.200000e+01 : f32
    %30 = arith.mulf %cst_15, %29 : f32
    %31 = arith.mulf %25, %25 : vector<1x32xf32>
    %32 = vector.shape_cast %31 : vector<1x32xf32> to vector<1x1x32xf32>
    %cst_16 = arith.constant dense<0.000000e+00> : vector<1xf32>
    %33 = vector.multi_reduction <add>, %32, %cst_16 [1, 2] : vector<1x1x32xf32> to vector<1xf32>
    %34 = vector.shape_cast %33 : vector<1xf32> to vector<1x1x1xf32>
    %35 = vector.extract %34[0, 0, 0] : f32 from vector<1x1x1xf32>
    %cst_17 = arith.constant 2.000000e+00 : f32
    %36 = arith.mulf %cst_17, %35 : f32
    %37 = arith.subf %30, %36 : f32
    %cst_18 = arith.constant 2.400000e+02 : f32
    %38 = arith.divf %37, %cst_18 : f32
    %cst_19 = arith.constant 4.000000e+00 : f32
    %39 = arith.divf %38, %cst_19 : f32
    %cst_20 = arith.constant 1.600000e+01 : f32
    %40 = arith.mulf %39, %cst_20 : f32
    %cst_21 = arith.constant -1.000000e+00 : f32
    %41 = arith.divf %cst_21, %40 : f32
    %42 = vector.broadcast %41 : f32 to vector<16x16xf32>
    %43 = arith.mulf %23, %42 : vector<16x16xf32>
    %44 = math.exp %43 : vector<16x16xf32>
    %45 = arith.mulf %44, %44 : vector<16x16xf32>
    %46 = arith.addf %44, %45 : vector<16x16xf32>
    %47 = arith.mulf %45, %45 : vector<16x16xf32>
    %48 = arith.addf %46, %47 : vector<16x16xf32>
    %49 = arith.mulf %47, %47 : vector<16x16xf32>
    %50 = arith.addf %48, %49 : vector<16x16xf32>
    %51 = arith.mulf %49, %49 : vector<16x16xf32>
    %52 = arith.addf %50, %51 : vector<16x16xf32>
    %53 = tpu.iota {dimensions = array<i32: 0>} : vector<16x1xi32>
    %c8_i32 = arith.constant 8 : i32
    %54 = vector.broadcast %c8_i32 : i32 to vector<16x1xi32>
    %55 = arith.cmpi slt, %53, %54 : vector<16x1xi32>
    %cst_22 = arith.constant 1.000000e+00 : f32
    %cst_23 = arith.constant -1.000000e+00 : f32
    %56 = vector.broadcast %cst_22 : f32 to vector<16x1xf32>
    %57 = vector.broadcast %cst_23 : f32 to vector<16x1xf32>
    %58 = arith.select %55, %56, %57 : vector<16x1xi1>, vector<16x1xf32>
    %59 = tpu.iota {dimensions = array<i32: 1>} : vector<1x16xi32>
    %c8_i32_24 = arith.constant 8 : i32
    %60 = vector.broadcast %c8_i32_24 : i32 to vector<1x16xi32>
    %61 = arith.cmpi slt, %59, %60 : vector<1x16xi32>
    %cst_25 = arith.constant 1.000000e+00 : f32
    %cst_26 = arith.constant -1.000000e+00 : f32
    %62 = vector.broadcast %cst_25 : f32 to vector<1x16xf32>
    %63 = vector.broadcast %cst_26 : f32 to vector<1x16xf32>
    %64 = arith.select %61, %62, %63 : vector<1x16xi1>, vector<1x16xf32>
    %65 = vector.broadcast %64 : vector<1x16xf32> to vector<16x16xf32>
    %66 = arith.mulf %52, %65 : vector<16x16xf32>
    %cst_27 = arith.constant dense<0.000000e+00> : vector<16xf32>
    %67 = vector.multi_reduction <add>, %66, %cst_27 [1] : vector<16x16xf32> to vector<16xf32>
    %68 = vector.shape_cast %67 : vector<16xf32> to vector<16x1xf32>
    %69 = arith.mulf %68, %58 : vector<16x1xf32>
    %70 = vector.shape_cast %69 : vector<16x1xf32> to vector<1x16x1xf32>
    %cst_28 = arith.constant dense<0.000000e+00> : vector<1xf32>
    %71 = vector.multi_reduction <add>, %70, %cst_28 [1, 2] : vector<1x16x1xf32> to vector<1xf32>
    %72 = vector.shape_cast %71 : vector<1xf32> to vector<1x1x1xf32>
    %73 = vector.extract %72[0, 0, 0] : f32 from vector<1x1x1xf32>
    %cst_29 = arith.constant 6.400000e+01 : f32
    %74 = arith.divf %73, %cst_29 : f32
    %c0_30 = arith.constant 0 : index
    %c0_31 = arith.constant 0 : index
    %75 = memref.load %arg2[%c0_30, %c0_31] : memref<1x1xf32, #tpu.memory_space<smem>>
    memref.store %74, %arg2[%c0_30, %c0_31] : memref<1x1xf32, #tpu.memory_space<smem>>
    return
  }
}

</mosaic_0001>

<bundles_post_ra>
// kernel: tpu_custom_call.1
= control target key start
LH: loop header
LB: loop body
LE: loop exit
PB: predicated region body
PF: predicated region fallthrough
CT: control target
= control target key end

     0   :  { %7 = vsyncpa [#allocation4], 0  ;;  %s471_s0 = inlined_call_operand.hbm [shape: f32[8,32], index: 0, kind: input, shape index: {}]   ;;  %s472_s1 = inlined_call_operand.hbm [shape: f32[8,32], index: 1, kind: input, shape index: {}]   ;;  %s473_s2 = inlined_call_operand.hbm [shape: f32[1,1], index: 2, kind: output, shape index: {}]  }
   0x1   :  { %8 = vsyncpa [#allocation7], 0 }
   0x2   :  { %9 = vsyncpa [#allocation5], 0  ;;  %s15_s11 = sshll.u32 %s471_s0, 4  ;;  %s411_s12 = smov [#allocation3]   ;;  %s16_s11 = int_to_ptr.hbm [resolvable:$true] %s15_s11 }
   0x3   :  { %s17_s13 = sshll.u32 %s411_s12, 4  ;;  %s26_s16 = sshll.u32 %s472_s1, 4  ;;  %s18_s13 = int_to_ptr.vmem [resolvable:$true] %s17_s13  ;;  %s27_s16 = int_to_ptr.hbm [resolvable:$true] %s26_s16 }
   0x4   :  { %20 = dma.hbm_to_vmem [thread:$0]  %s16_s11, 128, %s18_s13, [#allocation4]  }
   0x5   :  { %s412_s17 = smov [#allocation6]  }
   0x6   :  { %s28_s18 = sshll.u32 %s412_s17, 4  ;;  %s29_s18 = int_to_ptr.vmem [resolvable:$true] %s28_s18 }
   0x7   :  { %31 = dma.hbm_to_vmem [thread:$0]  %s27_s16, 128, %s29_s18, [#allocation7]  }
   0x8   :  { %405 = dma.done.wait [#allocation4], 128  }
   0x9   :  { %406 = vsyncadd [#allocation4], 4294967168 }
   0xa   :  { %407 = dma.done.wait [#allocation7], 128  }
   0xb   :  { %408 = vsyncadd [#allocation7], 4294967168  ;;  %v413_v0 = vmov 16.0   ;;  %vm41_vm0 = vcmask 261120   ;;  %v40_v1 = vld [vmem:[#allocation3] sm:$0xff]  ;;  %v43_v2 = vld [vmem:[#allocation6] sm:$0xff] }
   0xc   :  { %331 = vrcp.f32 %v413_v0  ;;  %42 = vst.msk [vmem:[#allocation2] sm:$0xff] %vm41_vm0, %v40_v1  ;;  %vm153_vm2 = vcmask 7168   ;;  %vm168_vm3 = vcmask 253952   ;;  %v414_v43 = vmov 240.0   ;;  %s290_s3 = sshll.u32 %s473_s2, 4  ;;  %s418_s7 = smov [#allocation8]   ;;  %s291_s3 = int_to_ptr.hbm [resolvable:$true] %s290_s3 }
   0xd   :  { %44 = vst.msk [vmem:[#allocation2 + $0x8] sm:$0xff] %vm41_vm0, %v43_v2  ;;  %333 = vrcp.f32 %v414_v43  ;;  %v415_v44 = vmov 4.0   ;;  %vm253_vm11 = vcmask 130048  }
   0xe   :  { %335 = vrcp.f32 %v415_v44 }
  0x12   :  { %v332_v3 = vpop.eup %331 }
  0x13   :  { %v57_v4 = vmul.f32 16.0, %v332_v3  ;;  %v45_v5 = vld [vmem:[#allocation2] sm:$0xff]  ;;  %vm61_vm1 = vweird.f32 %v332_v3  ;;  %v334_v45 = vpop.eup %333 }
  0x14   :  { %v46_v6 = vld [vmem:[#allocation2 + $0x8] sm:$0xff]  ;;  %v47_v7 = vsel %vm41_vm0, %v45_v5, 0.0  ;;  %v336_v47 = vpop.eup %335  ;;  %v182_v50 = vmul.f32 240.0, %v334_v45  ;;  %vm186_vm4 = vweird.f32 %v334_v45 }
  0x15   :  { %v48_v8 = vsel %vm41_vm0, %v46_v6, 0.0  ;;  %v58_v9 = vsub.f32 1.0, %v57_v4  ;;  %v191_v51 = vmul.f32 4.0, %v336_v47  ;;  %vm195_vm5 = vweird.f32 %v336_v47 }
  0x16   :  { %v49_v10 = vadd.f32 %v48_v8, %v47_v7  ;;  %v183_v54 = vsub.f32 1.0, %v182_v50 }
  0x17   :  { %v59_v12 = vmul.f32 %v332_v3, %v58_v9  ;;  %v192_v56 = vsub.f32 1.0, %v191_v51 }
  0x18   :  { %v50_v11 = vrot.slane %v49_v10, 4  ;;  %v184_v61 = vmul.f32 %v334_v45, %v183_v54 }
  0x19   :  { %v60_v15 = vadd.f32 %v332_v3, %v59_v12  ;;  %v193_v62 = vmul.f32 %v336_v47, %v192_v56 }
  0x1a   :  { %v51_v13 = vadd.f32 %v50_v11, %v49_v10  ;;  %v185_v1 = vadd.f32 %v334_v45, %v184_v61 }
  0x1b   :  { %v62_v18 = vsel %vm61_vm1, %v332_v3, %v60_v15  ;;  %v194_v2 = vadd.f32 %v336_v47, %v193_v62 }
  0x1c   :  { %v52_v14 = vrot.slane %v51_v13, 2 }
  0x1e   :  { %v53_v16 = vadd.f32 %v52_v14, %v51_v13 }
  0x20   :  { %v54_v17 = vrot.slane %v53_v16, 1 }
  0x22   :  { %v55_v19 = vadd.f32 %v54_v17, %v53_v16 }
  0x24   :  { %v63_v20 = vmul.f32 %v62_v18, %v55_v19 }
  0x26   :  { %v64_v21 = vsub.f32 %v45_v5, %v63_v20  ;;  %v65_v22 = vsub.f32 %v46_v6, %v63_v20  ;;  %v187_v5 = vsel %vm186_vm4, %v334_v45, %v185_v1  ;;  %v196_v6 = vsel %vm195_vm5, %v336_v47, %v194_v2 }
  0x28   :  { %v95_v23 = vmul.f32 %v64_v21, %v64_v21  ;;  %302 = vmatpush.xpose.msk.msra.mxu0 %vm41_vm0, %v65_v22  ;;  %306 = vmatpush.xpose.msk.msra.mxu1 %vm41_vm0, %v65_v22  ;;  %v96_v25 = vmul.f32 %v65_v22, %v65_v22  ;;  %v144_v27 = vsel %vm41_vm0, %v64_v21, 0.0  ;;  %v145_v28 = vsel %vm41_vm0, %v65_v22, 0.0 }
  0x29   :  { %v146_v29 = vadd.f32 %v145_v28, %v144_v27 }
  0x2a   :  { %v97_v24 = vsel %vm41_vm0, %v95_v23, 0.0  ;;  %v100_v26 = vsel %vm41_vm0, %v96_v25, 0.0 }
  0x2b   :  { %98 = vadd.xlane.f32.xlu0 %v97_v24  ;;  %v147_v30 = vrot.slane %v146_v29, 4 }
  0x2c   :  { %303 = vmatpush.xpose.msk.msra.mxu0 %vm41_vm0, %v64_v21  ;;  %307 = vmatpush.xpose.msk.msra.mxu1 %vm41_vm0, %v64_v21 }
  0x2d   :  { %v148_v31 = vadd.f32 %v147_v30, %v146_v29 }
  0x2f   :  { %304 = vmatmul.msk.f32.vlgmr.msra.gmra.mxu0 %vm41_vm0, %v64_v21  ;;  %305 = vmatmul.msk.f32.vlgmr.msra.gmra.mxu1 %vm41_vm0, %v65_v22  ;;  %v149_v32 = vrot.slane %v148_v31, 2 }
  0x31   :  { %v150_v34 = vadd.f32 %v149_v32, %v148_v31 }
  0x33   :  { %101 = vadd.xlane.f32.xlu0 %v100_v26  ;;  %v151_v35 = vrot.slane %v150_v34, 1 }
  0x35   :  { %v152_v39 = vadd.f32 %v151_v35, %v150_v34 }
  0x37   :  { %v167_v41 = vmul.f32 %v152_v39, %v152_v39 }
  0x39   :  { %v169_v42 = vsel %vm168_vm3, %v167_v41, 0.0 }
  0x9e   :  { %v454_v33 = vpop.xlane.xlu0 %98 }
  0x9f   :  { %103 = vxpose.xlu2.b32.start [1/2] (short) (narrow) %v454_v33, 8  ;;  %v154_v37 = vsel %vm153_vm2, %v454_v33, 0.0 }
  0xa6   :  { %v457_v36 = vpop.xlane.xlu0 %101 }
  0xa7   :  { %104 = vxpose.xlu2.b32.end [2/2] (short) (narrow) %v457_v36, 8  ;;  %v155_v38 = vsel %vm153_vm2, %v457_v36, 0.0 }
  0xa8   :  { %v156_v40 = vadd.f32 %v155_v38, %v154_v37  ;;  %v247_v37 = vlaneseq }
  0xaa   :  { %157 = vadd.xlane.f32.xlu1 %v156_v40 }
  0xac   :  { %v89_v20 = vpop.f32.mrf.mxu0  ;;  %v92_v21 = vpop.f32.mrf.mxu1 }
  0xad   :  { %v138_v24 = vmul.f32 2.0, %v89_v20  ;;  %v139_v25 = vmul.f32 2.0, %v92_v21 }
  0xb2   :  { %170 = vadd.xlane.f32.xlu1 %v169_v42 }
 0x11d   :  { %v158_v46 = vpop.xlane.xlu1 %157 }
 0x11e   :  { %v159_v48 = vrot.slane %v158_v46, 4 }
 0x120   :  { %v160_v49 = vadd.f32 %v159_v48, %v158_v46 }
 0x122   :  { %v161_v52 = vrot.slane %v160_v49, 2 }
 0x124   :  { %v162_v53 = vadd.f32 %v161_v52, %v160_v49 }
 0x125   :  { %v171_v55 = vpop.xlane.xlu1 %170 }
 0x126   :  { %v172_v57 = vrot.slane %v171_v55, 4  ;;  %v163_v58 = vrot.slane %v162_v53, 1 }
 0x128   :  { %v173_v59 = vadd.f32 %v172_v57, %v171_v55  ;;  %v164_v60 = vadd.f32 %v163_v58, %v162_v53  ;;  %v416_v53 = vmov -1.0  }
 0x12a   :  { %v174_v63 = vrot.slane %v173_v59, 2  ;;  %308 = vpush %v164_v60 }
 0x12c   :  { %v175_v0 = vadd.f32 %v174_v63, %v173_v59 }
 0x12e   :  { %v176_v3 = vrot.slane %v175_v0, 1 }
 0x130   :  { %v177_v4 = vadd.f32 %v176_v3, %v175_v0  ;;  %v417_v3 = vmov 64.0  }
 0x132   :  { %310 = vpush %v177_v4 }
 0x133   :  { %312 = vpush %v187_v5 }
 0x134   :  { %314 = vpush %v196_v6 }
 0x138   :  { %v119_v18 = vpop.trf.xlu2 }
 0x139   :  { %v135_v19 = vperm.slane %v119_v18, 0 }
 0x13b   :  { %v136_v22 = vadd.f32 %v135_v19, %v454_v33  ;;  %v137_v23 = vadd.f32 %v135_v19, %v457_v36  ;;  %v248_v36 = vand.u32 127, %v247_v37 }
 0x13d   :  { %v140_v26 = vsub.f32 %v136_v22, %v138_v24  ;;  %v141_v27 = vsub.f32 %v137_v23, %v139_v25  ;;  %vm249_vm10 = vcmp.lt.s32.totalorder %v248_v36, 8 }
 0x13e   :  { %v250_v54 = vsel %vm249_vm10, 1.0, %v416_v53 }
 0x13f   :  { %v142_v28 = vmax.f32 %v140_v26, 0.0  ;;  %v143_v29 = vmax.f32 %v141_v27, 0.0 }
 0x15b   :  { %s309_s0 = spop %308 }
 0x15c   :  { %s166_s1 = smul.f32 32.0, %s309_s0 }
 0x163   :  { %s311_s19 = spop %310 }
 0x164   :  { %s179_s20 = smul.f32 2.0, %s311_s19  ;;  %s313_s21 = spop %312 }
 0x165   :  { %s315_s23 = spop %314 }
 0x166   :  { %s180_s22 = ssub.f32 %s166_s1, %s179_s20 }
 0x168   :  { %s189_s24 = smul.f32 %s313_s21, %s180_s22 }
 0x16a   :  { %s198_s25 = smul.f32 %s315_s23, %s189_s24 }
 0x16c   :  { %s199_s26 = smul.f32 16.0, %s198_s25 }
 0x16e   :  { %v200_v7 = vstv %s199_s26 }
 0x16f   :  { %337 = vrcp.f32 %v200_v7  ;;  %v212_v11 = vand.u32 2147483648, %v200_v7  ;;  %v210_v13 = vand.u32 2147483647, %v200_v7  ;;  %vm206_vm7 = vweird.f32 %v200_v7 }
 0x171   :  { %v213_v15 = vor.u32 1.1754944e-38, %v212_v11  ;;  %vm211_vm9 = vcmp.eq.f32.partialorder %v210_v13, 8.507059e+37 }
 0x175   :  { %v338_v8 = vpop.eup %337 }
 0x176   :  { %v202_v9 = vmul.f32 %v338_v8, %v200_v7  ;;  %vm207_vm6 = vweird.f32 %v338_v8 }
 0x177   :  { %vm208_vm8 = vmor %vm206_vm7, %vm207_vm6 }
 0x178   :  { %v203_v10 = vsub.f32 1.0, %v202_v9 }
 0x17a   :  { %v204_v12 = vmul.f32 %v338_v8, %v203_v10 }
 0x17c   :  { %v205_v14 = vadd.f32 %v338_v8, %v204_v12 }
 0x17e   :  { %v209_v16 = vsel %vm208_vm8, %v338_v8, %v205_v14 }
 0x17f   :  { %v214_v17 = vsel %vm211_vm9, %v213_v15, %v209_v16 }
 0x180   :  { %316 = vpush %v214_v17 }
 0x1b1   :  { %s317_s27 = spop %316 }
 0x1b2   :  { %s216_s28 = smul.f32 -1.0, %s317_s27 }
 0x1b4   :  { %v217_v30 = vstv %s216_s28 }
 0x1b5   :  { %v218_v31 = vmul.f32 %v217_v30, %v142_v28  ;;  %v219_v32 = vmul.f32 %v217_v30, %v143_v29 }
 0x1b7   :  { %v220_v34 = vmul.f32 1.442695, %v218_v31  ;;  %v222_v35 = vmul.f32 1.442695, %v219_v32 }
 0x1b9   :  { %339 = vpow2.f32 %v220_v34 }
 0x1ba   :  { %341 = vpow2.f32 %v222_v35 }
 0x1bb   :  { %343 = vrcp.f32 %v417_v3 }
 0x1bf   :  { %v340_v38 = vpop.eup %339 }
 0x1c0   :  { %v342_v33 = vpop.eup %341  ;;  %v224_v39 = vmul.f32 %v340_v38, %v340_v38 }
 0x1c1   :  { %v225_v40 = vmul.f32 %v342_v33, %v342_v33  ;;  %v344_v4 = vpop.eup %343 }
 0x1c2   :  { %v226_v41 = vadd.f32 %v340_v38, %v224_v39  ;;  %v228_v42 = vmul.f32 %v224_v39, %v224_v39  ;;  %v275_v5 = vmul.f32 64.0, %v344_v4  ;;  %vm279_vm12 = vweird.f32 %v344_v4 }
 0x1c3   :  { %v227_v43 = vadd.f32 %v342_v33, %v225_v40  ;;  %v229_v44 = vmul.f32 %v225_v40, %v225_v40 }
 0x1c4   :  { %v230_v45 = vadd.f32 %v228_v42, %v226_v41  ;;  %v232_v46 = vmul.f32 %v228_v42, %v228_v42  ;;  %v276_v6 = vsub.f32 1.0, %v275_v5 }
 0x1c5   :  { %v231_v47 = vadd.f32 %v229_v44, %v227_v43  ;;  %v233_v48 = vmul.f32 %v229_v44, %v229_v44 }
 0x1c6   :  { %v234_v49 = vadd.f32 %v232_v46, %v230_v45  ;;  %v236_v50 = vmul.f32 %v232_v46, %v232_v46  ;;  %v277_v10 = vmul.f32 %v344_v4, %v276_v6 }
 0x1c7   :  { %v235_v51 = vadd.f32 %v233_v48, %v231_v47  ;;  %v237_v52 = vmul.f32 %v233_v48, %v233_v48 }
 0x1c8   :  { %v238_v55 = vadd.f32 %v236_v50, %v234_v49  ;;  %v278_v13 = vadd.f32 %v344_v4, %v277_v10 }
 0x1c9   :  { %v239_v56 = vadd.f32 %v237_v52, %v235_v51 }
 0x1ca   :  { %v251_v57 = vmul.f32 %v250_v54, %v238_v55  ;;  %v280_v16 = vsel %vm279_vm12, %v344_v4, %v278_v13 }
 0x1cb   :  { %v252_v58 = vmul.f32 %v250_v54, %v239_v56 }
 0x1cc   :  { %v254_v59 = vsel %vm253_vm11, %v251_v57, 0.0 }
 0x1cd   :  { %v257_v60 = vsel %vm253_vm11, %v252_v58, 0.0  ;;  %255 = vadd.xlane.f32.xlu1 %v254_v59 }
 0x1ce   :  { %258 = vadd.xlane.f32.xlu0 %v257_v60 }
 0x240   :  { %v256_v62 = vpop.xlane.xlu1 %255 }
 0x241   :  { %v259_v61 = vpop.xlane.xlu0 %258  ;;  %v262_v1 = vsel %vm153_vm2, %v256_v62, 0.0 }
 0x242   :  { %v261_v63 = vmul.f32 -1.0, %v259_v61 }
 0x244   :  { %v263_v0 = vsel %vm153_vm2, %v261_v63, 0.0 }
 0x245   :  { %v264_v2 = vadd.f32 %v263_v0, %v262_v1 }
 0x247   :  { %265 = vadd.xlane.f32.xlu2 %v264_v2 }
 0x2ba   :  { %v266_v7 = vpop.xlane.xlu2 %265 }
 0x2bb   :  { %v267_v8 = vrot.slane %v266_v7, 4 }
 0x2bd   :  { %v268_v9 = vadd.f32 %v267_v8, %v266_v7 }
 0x2bf   :  { %v269_v11 = vrot.slane %v268_v9, 2 }
 0x2c1   :  { %v270_v12 = vadd.f32 %v269_v11, %v268_v9 }
 0x2c3   :  { %v271_v14 = vrot.slane %v270_v12, 1 }
 0x2c5   :  { %v272_v15 = vadd.f32 %v271_v14, %v270_v12 }
 0x2c7   :  { %318 = vpush %v272_v15 }
 0x2c8   :  { %320 = vpush %v280_v16 }
 0x2f8   :  { %s319_s4 = spop %318 }
 0x2f9   :  { %s321_s5 = spop %320 }
 0x2fa   :  { %s282_s6 = smul.f32 %s321_s5, %s319_s4 }
 0x2fc   :  { %284 = sst [smem:[#allocation8]] %s282_s6 }
 0x2fd   :  { %293 = dma.smem_to_hbm %s418_s7, 16, %s291_s3, [#allocation5]  }
 0x2fe   :  { %409 = dma.done.wait [#allocation5], 16  }
 0x2ff   :  { %410 = vsyncadd [#allocation5], 4294967280 }
 0x300   :  { %298 = sfence }
 0x301   :  { %299 = vsyncpa [#allocation4], 1 }
 0x302   :  { %300 = vsyncpa [#allocation7], 1 }
 0x303   :  { %301 = vsyncpa [#allocation5], 1 }

</bundles_post_ra>
